<compile_context>
chip_gen: v5e
topology: v5e:2x2
jax: 0.10.0
libtpu: 0.0.40
codegen_flags: <defaults>
</compile_context>

<pallas_src>
import jax
import jax.numpy as jnp
from jax.experimental import pallas as pl
from jax.experimental.pallas import tpu as pltpu


def qnet_mlp_kernel(obs_ref, act_ref, w1o_ref, w1a_ref, b1_ref,
                    w2_ref, b2_ref, w3r_ref, b3_ref, o_ref):
    """Fused 3-layer MLP on one batch tile.

    h1 = relu(obs @ W1_obs + act @ W1_act + b1)   (== relu(concat @ W1 + b1))
    h2 = relu(h1 @ W2 + b2)
    q  = sum(h2 * w3_row, axis=-1) + b3           (VPU/XLU path; N=1 matmul avoided)
    Output is stored as one lane-dense (1, tile) row per grid step.
    """
    h1 = jnp.dot(obs_ref[...], w1o_ref[...], preferred_element_type=jnp.float32)
    h1 = h1 + jnp.dot(act_ref[...], w1a_ref[...], preferred_element_type=jnp.float32)
    h1 = jnp.maximum(h1 + b1_ref[...], 0.0)                        # ReLU

    h2 = jnp.dot(h1, w2_ref[...], preferred_element_type=jnp.float32) + b2_ref[...]
    h2 = jnp.maximum(h2, 0.0)                                       # ReLU

    q = jnp.sum(h2 * w3r_ref[...], axis=-1) + b3_ref[0]             # (tile,)
    o_ref[...] = q.reshape(1, -1)                                    # lane-dense store


def _round_up(x, m):
    return ((x + m - 1) // m) * m


def continuous_qnet_forward(cent_obs, actions, params, *, tm=4096):
    """Batch-tiled fused Pallas MLP for ContinuousQNet.

    cent_obs: (B, obs_dim) float32
    actions : (B, act_dim) float32 (Discrete actions pre-encoded as floats/one-hot)
    returns : (B, 1) float32 q-values
    """
    w1, b1, w2, b2, w3, b3 = params
    B, obs_dim = cent_obs.shape
    act_dim = actions.shape[1]
    h1_dim = w1.shape[1]
    h2_dim = w2.shape[1]

    # concat fusion: concat([obs, act]) @ W1 == obs @ W1[:obs_dim] + act @ W1[obs_dim:]
    w1_obs = w1[:obs_dim, :]
    w1_act = w1[obs_dim:, :]
    w3_row = w3.T                      # (1, H2) row vector for the VPU reduction
    b3_smem = b3.reshape(1)            # scalar bias lives in SMEM

    # Batch tile: multiple of 8 (sublane), capped at ceil(B/2) so the grid has
    # >=2 steps whenever possible (megacore on v7x), and capped at tm for VMEM.
    tile = max(8, min(tm, _round_up(pl.cdiv(B, 2), 8)))
    num_tiles = pl.cdiv(B, tile)       # ragged last block handled by Pallas

    row_obs_spec = pl.BlockSpec((tile, obs_dim), lambda i: (i, 0))
    row_act_spec = pl.BlockSpec((tile, act_dim), lambda i: (i, 0))
    # Parameters stay resident across the whole batch loop (constant index_map).
    resident = lambda shape: pl.BlockSpec(shape, lambda i: (0, 0))

    out = pl.pallas_call(
        qnet_mlp_kernel,
        out_shape=jax.ShapeDtypeStruct((num_tiles, tile), jnp.float32),
        grid=(num_tiles,),
        in_specs=[
            row_obs_spec,
            row_act_spec,
            resident((obs_dim, h1_dim)),                        # W1_obs
            resident((act_dim, h1_dim)),                        # W1_act
            resident((1, h1_dim)),                              # b1
            resident((h1_dim, h2_dim)),                         # W2
            resident((1, h2_dim)),                              # b2
            resident((1, h2_dim)),                              # w3 row
            pl.BlockSpec(memory_space=pltpu.MemorySpace.SMEM),  # b3 scalar
        ],
        out_specs=pl.BlockSpec((1, tile), lambda i: (i, 0)),
        compiler_params=pltpu.CompilerParams(
            dimension_semantics=("parallel",),      # shard batch loop across TCs
            vmem_limit_bytes=32 * 1024 * 1024),     # headroom for fat tiles on v5e
    )(cent_obs, actions, w1_obs, w1_act, b1, w2, b2, w3_row, b3_smem)

    # Flatten lane-dense output rows back to (B, 1); rows >= B (ragged tail) are
    # garbage by construction and sliced off here.
    return out.reshape(-1)[:B].reshape(B, 1)


def init_params(key, d0, h1, h2):
    """Deterministic synthetic parameters (Linear layers of the PlainMLP)."""
    ks = jax.random.split(key, 6)
    scale = lambda fan_in: 1.0 / jnp.sqrt(jnp.float32(fan_in))
    w1 = jax.random.uniform(ks[0], (d0, h1), jnp.float32, -1, 1) * scale(d0)
    b1 = jax.random.uniform(ks[1], (1, h1), jnp.float32, -1, 1) * scale(d0)
    w2 = jax.random.uniform(ks[2], (h1, h2), jnp.float32, -1, 1) * scale(h1)
    b2 = jax.random.uniform(ks[3], (1, h2), jnp.float32, -1, 1) * scale(h1)
    w3 = jax.random.uniform(ks[4], (h2, 1), jnp.float32, -1, 1) * scale(h2)
    b3 = jax.random.uniform(ks[5], (1, 1), jnp.float32, -1, 1) * scale(h2)
    return (w1, b1, w2, b2, w3, b3)


def reference_forward(cent_obs, actions, params):
    """Pure-JAX reference of the same forward pass (uses the explicit concat)."""
    w1, b1, w2, b2, w3, b3 = params
    x = jnp.concatenate([cent_obs, actions], axis=-1)
    h1 = jax.nn.relu(x @ w1 + b1)
    h2 = jax.nn.relu(h1 @ w2 + b2)
    return h2 @ w3 + b3


if __name__ == "__main__":
    # Small shapes consistent with the module:
    #   cent_obs_space: Box(obs_dim=24)       -> no CNN feature extractor
    #   act_spaces    : [Box(3), Discrete(5)] -> combined action dim = 8
    #   hidden_sizes  : [32, 32], activation_func: relu
    OBS_DIM, ACT_DIM = 24, 8
    H1, H2 = 32, 32
    D0 = OBS_DIM + ACT_DIM  # get_combined_dim

    key = jax.random.PRNGKey(0)
    k_obs, k_act, k_par = jax.random.split(key, 3)
    params = init_params(k_par, D0, H1, H2)

    # Check 1: tiny exact-fit batch (single grid step).
    B = 8
    cent_obs = jax.random.normal(k_obs, (B, OBS_DIM), jnp.float32)
    actions = jax.random.normal(k_act, (B, ACT_DIM), jnp.float32)
    q = jax.block_until_ready(continuous_qnet_forward(cent_obs, actions, params))
    q_ref = reference_forward(cent_obs, actions, params)
    assert q.shape == (B, 1)
    assert jnp.allclose(q, q_ref, atol=1e-5, rtol=1e-5), "mismatch vs JAX reference (B=8)"

    # Check 2: multi-step grid with a ragged last block (no jnp.pad path).
    B2 = 20
    cent_obs2 = jax.random.normal(k_obs, (B2, OBS_DIM), jnp.float32)
    actions2 = jax.random.normal(k_act, (B2, ACT_DIM), jnp.float32)
    q2 = jax.block_until_ready(continuous_qnet_forward(cent_obs2, actions2, params))
    q2_ref = reference_forward(cent_obs2, actions2, params)
    assert q2.shape == (B2, 1)
    assert jnp.allclose(q2, q2_ref, atol=1e-5, rtol=1e-5), "mismatch vs JAX reference (B=20)"

    print("KERNEL_OK")
</pallas_src>

<mosaic_0001>
module attributes {stable_mosaic.version = 11 : i64} {
  func.func @qnet_mlp_kernel(%arg0: i32, %arg1: memref<8x24xf32, #tpu.memory_space<vmem>>, %arg2: memref<8x8xf32, #tpu.memory_space<vmem>>, %arg3: memref<24x32xf32, #tpu.memory_space<vmem>>, %arg4: memref<8x32xf32, #tpu.memory_space<vmem>>, %arg5: memref<1x32xf32, #tpu.memory_space<vmem>>, %arg6: memref<32x32xf32, #tpu.memory_space<vmem>>, %arg7: memref<1x32xf32, #tpu.memory_space<vmem>>, %arg8: memref<1x32xf32, #tpu.memory_space<vmem>>, %arg9: memref<1xf32, #tpu.memory_space<smem>>, %arg10: memref<1x8xf32, #tpu.memory_space<vmem>>) attributes {dimension_semantics = [#tpu.dimension_semantics<parallel>], iteration_bounds = array<i64: 1>, scalar_prefetch = 0 : i64, scratch_operands = 0 : i64, tpu.core_type = #tpu.core_type<tc>, window_params = [{transform_indices = @transform_0, window_bounds = array<i64: 8, 24>}, {transform_indices = @transform_1, window_bounds = array<i64: 8, 8>}, {pipeline_mode = #tpu.pipeline_mode<synchronous>, transform_indices = @transform_2, window_bounds = array<i64: 24, 32>}, {pipeline_mode = #tpu.pipeline_mode<synchronous>, transform_indices = @transform_3, window_bounds = array<i64: 8, 32>}, {pipeline_mode = #tpu.pipeline_mode<synchronous>, transform_indices = @transform_4, window_bounds = array<i64: 1, 32>}, {pipeline_mode = #tpu.pipeline_mode<synchronous>, transform_indices = @transform_5, window_bounds = array<i64: 32, 32>}, {pipeline_mode = #tpu.pipeline_mode<synchronous>, transform_indices = @transform_6, window_bounds = array<i64: 1, 32>}, {pipeline_mode = #tpu.pipeline_mode<synchronous>, transform_indices = @transform_7, window_bounds = array<i64: 1, 32>}, {transform_indices = @transform_8, window_bounds = array<i64: 1>}, {transform_indices = @transform_9, window_bounds = array<i64: 1, 8>}]} {
    %c0 = arith.constant 0 : index
    %c0_0 = arith.constant 0 : index
    %0 = vector.load %arg1[%c0, %c0_0] : memref<8x24xf32, #tpu.memory_space<vmem>>, vector<8x24xf32>
    %c0_1 = arith.constant 0 : index
    %c0_2 = arith.constant 0 : index
    %1 = vector.load %arg3[%c0_1, %c0_2] : memref<24x32xf32, #tpu.memory_space<vmem>>, vector<24x32xf32>
    %cst = arith.constant dense<0.000000e+00> : vector<8x32xf32>
    %2 = tpu.matmul %0, %1, %cst {dimension_numbers = #tpu.dot_dimension_numbers<[1], [0], [0], [1], [0, 0, 1, 1], [], []>} : vector<8x24xf32>, vector<24x32xf32>, vector<8x32xf32> -> vector<8x32xf32>
    %c0_3 = arith.constant 0 : index
    %c0_4 = arith.constant 0 : index
    %3 = vector.load %arg2[%c0_3, %c0_4] : memref<8x8xf32, #tpu.memory_space<vmem>>, vector<8x8xf32>
    %c0_5 = arith.constant 0 : index
    %c0_6 = arith.constant 0 : index
    %4 = vector.load %arg4[%c0_5, %c0_6] : memref<8x32xf32, #tpu.memory_space<vmem>>, vector<8x32xf32>
    %cst_7 = arith.constant dense<0.000000e+00> : vector<8x32xf32>
    %5 = tpu.matmul %3, %4, %cst_7 {dimension_numbers = #tpu.dot_dimension_numbers<[1], [0], [0], [1], [0, 0, 1, 1], [], []>} : vector<8x8xf32>, vector<8x32xf32>, vector<8x32xf32> -> vector<8x32xf32>
    %6 = arith.addf %2, %5 : vector<8x32xf32>
    %c0_8 = arith.constant 0 : index
    %c0_9 = arith.constant 0 : index
    %7 = vector.load %arg5[%c0_8, %c0_9] : memref<1x32xf32, #tpu.memory_space<vmem>>, vector<1x32xf32>
    %8 = vector.broadcast %7 : vector<1x32xf32> to vector<8x32xf32>
    %9 = arith.addf %6, %8 : vector<8x32xf32>
    %cst_10 = arith.constant 0.000000e+00 : f32
    %10 = vector.broadcast %cst_10 : f32 to vector<8x32xf32>
    %11 = arith.maximumf %9, %10 : vector<8x32xf32>
    %c0_11 = arith.constant 0 : index
    %c0_12 = arith.constant 0 : index
    %12 = vector.load %arg6[%c0_11, %c0_12] : memref<32x32xf32, #tpu.memory_space<vmem>>, vector<32x32xf32>
    %cst_13 = arith.constant dense<0.000000e+00> : vector<8x32xf32>
    %13 = tpu.matmul %11, %12, %cst_13 {dimension_numbers = #tpu.dot_dimension_numbers<[1], [0], [0], [1], [0, 0, 1, 1], [], []>} : vector<8x32xf32>, vector<32x32xf32>, vector<8x32xf32> -> vector<8x32xf32>
    %c0_14 = arith.constant 0 : index
    %c0_15 = arith.constant 0 : index
    %14 = vector.load %arg7[%c0_14, %c0_15] : memref<1x32xf32, #tpu.memory_space<vmem>>, vector<1x32xf32>
    %15 = vector.broadcast %14 : vector<1x32xf32> to vector<8x32xf32>
    %16 = arith.addf %13, %15 : vector<8x32xf32>
    %cst_16 = arith.constant 0.000000e+00 : f32
    %17 = vector.broadcast %cst_16 : f32 to vector<8x32xf32>
    %18 = arith.maximumf %16, %17 : vector<8x32xf32>
    %c0_17 = arith.constant 0 : index
    %c0_18 = arith.constant 0 : index
    %19 = vector.load %arg8[%c0_17, %c0_18] : memref<1x32xf32, #tpu.memory_space<vmem>>, vector<1x32xf32>
    %20 = vector.broadcast %19 : vector<1x32xf32> to vector<8x32xf32>
    %21 = arith.mulf %18, %20 : vector<8x32xf32>
    %cst_19 = arith.constant dense<0.000000e+00> : vector<8xf32>
    %22 = vector.multi_reduction <add>, %21, %cst_19 [1] : vector<8x32xf32> to vector<8xf32>
    %c0_20 = arith.constant 0 : index
    %23 = memref.load %arg9[%c0_20] : memref<1xf32, #tpu.memory_space<smem>>
    %24 = vector.broadcast %23 : f32 to vector<8xf32>
    %25 = arith.addf %22, %24 : vector<8xf32>
    %26 = vector.shape_cast %25 : vector<8xf32> to vector<1x8xf32>
    %c0_21 = arith.constant 0 : index
    %c0_22 = arith.constant 0 : index
    %27 = vector.load %arg10[%c0_21, %c0_22] : memref<1x8xf32, #tpu.memory_space<vmem>>, vector<1x8xf32>
    tpu.vector_store %arg10[%c0_21, %c0_22], %26 {strides = array<i32>} : memref<1x8xf32, #tpu.memory_space<vmem>>, vector<1x8xf32>,
    return
  }
  func.func @transform_0(%arg0: i32) -> (i32, i32) {
    %c0_i32 = arith.constant 0 : i32
    %c0_i32_0 = arith.constant 0 : i32
    return %arg0, %c0_i32 : i32, i32
  }
  func.func @transform_1(%arg0: i32) -> (i32, i32) {
    %c0_i32 = arith.constant 0 : i32
    %c0_i32_0 = arith.constant 0 : i32
    return %arg0, %c0_i32 : i32, i32
  }
  func.func @transform_2(%arg0: i32) -> (i32, i32) {
    %c0_i32 = arith.constant 0 : i32
    %c0_i32_0 = arith.constant 0 : i32
    %c0_i32_1 = arith.constant 0 : i32
    return %c0_i32, %c0_i32_0 : i32, i32
  }
  func.func @transform_3(%arg0: i32) -> (i32, i32) {
    %c0_i32 = arith.constant 0 : i32
    %c0_i32_0 = arith.constant 0 : i32
    %c0_i32_1 = arith.constant 0 : i32
    return %c0_i32, %c0_i32_0 : i32, i32
  }
  func.func @transform_4(%arg0: i32) -> (i32, i32) {
    %c0_i32 = arith.constant 0 : i32
    %c0_i32_0 = arith.constant 0 : i32
    %c0_i32_1 = arith.constant 0 : i32
    return %c0_i32, %c0_i32_0 : i32, i32
  }
  func.func @transform_5(%arg0: i32) -> (i32, i32) {
    %c0_i32 = arith.constant 0 : i32
    %c0_i32_0 = arith.constant 0 : i32
    %c0_i32_1 = arith.constant 0 : i32
    return %c0_i32, %c0_i32_0 : i32, i32
  }
  func.func @transform_6(%arg0: i32) -> (i32, i32) {
    %c0_i32 = arith.constant 0 : i32
    %c0_i32_0 = arith.constant 0 : i32
    %c0_i32_1 = arith.constant 0 : i32
    return %c0_i32, %c0_i32_0 : i32, i32
  }
  func.func @transform_7(%arg0: i32) -> (i32, i32) {
    %c0_i32 = arith.constant 0 : i32
    %c0_i32_0 = arith.constant 0 : i32
    %c0_i32_1 = arith.constant 0 : i32
    return %c0_i32, %c0_i32_0 : i32, i32
  }
  func.func @transform_8(%arg0: i32) -> i32 {
    %c0_i32 = arith.constant 0 : i32
    %c0_i32_0 = arith.constant 0 : i32
    return %c0_i32 : i32
  }
  func.func @transform_9(%arg0: i32) -> (i32, i32) {
    %c0_i32 = arith.constant 0 : i32
    %c0_i32_0 = arith.constant 0 : i32
    return %arg0, %c0_i32 : i32, i32
  }
}

</mosaic_0001>

<bundles_post_ra>
// kernel: tpu_custom_call.1
= control target key start
LH: loop header
LB: loop body
LE: loop exit
PB: predicated region body
PF: predicated region fallthrough
CT: control target
= control target key end

     0   :  { %15 = vsyncpa [#allocation4], 0  ;;  %s490_s0 = inlined_call_operand.hbm [shape: f32[8,24], index: 0, kind: input, shape index: {}]   ;;  %s491_s1 = inlined_call_operand.hbm [shape: f32[8,8], index: 1, kind: input, shape index: {}]   ;;  %s492_s2 = inlined_call_operand.hbm [shape: f32[24,32], index: 2, kind: input, shape index: {}]   ;;  %s493_s3 = inlined_call_operand.hbm [shape: f32[8,32], index: 3, kind: input, shape index: {}]   ;;  %s494_s4 = inlined_call_operand.vmem [shape: f32[1,32], index: 4, kind: input, shape index: {}]   ;;  %s495_s5 = inlined_call_operand.hbm [shape: f32[32,32], index: 5, kind: input, shape index: {}]   ;;  %s496_s6 = inlined_call_operand.vmem [shape: f32[1,32], index: 6, kind: input, shape index: {}]   ;;  %s497_s7 = inlined_call_operand.vmem [shape: f32[1,32], index: 7, kind: input, shape index: {}]   ;;  %s498_s8 = inlined_call_operand.<no memory space> [shape: f32[1], index: 8, kind: input, shape index: {}]   ;;  %s499_s9 = inlined_call_operand.hbm [shape: f32[1,8], index: 9, kind: output, shape index: {}]  }
   0x1   :  { %16 = vsyncpa [#allocation7], 0 }
   0x2   :  { %17 = vsyncpa [#allocation10], 0  ;;  %s35_s11 = sshll.u32 %s491_s1, 4  ;;  %s36_s11 = int_to_ptr.hbm [resolvable:$true] %s35_s11 }
   0x3   :  { %18 = vsyncpa [#allocation5], 0  ;;  %s402_s12 = smov [#allocation6]   ;;  %s59_s16 = sshll.u32 %s493_s3, 4  ;;  %s60_s16 = int_to_ptr.hbm [resolvable:$true] %s59_s16 }
   0x4   :  { %s37_s13 = sshll.u32 %s402_s12, 4  ;;  %s403_s17 = smov [#allocation9]   ;;  %s38_s13 = int_to_ptr.vmem [resolvable:$true] %s37_s13 }
   0x5   :  { %40 = dma.hbm_to_vmem [thread:$0]  %s36_s11, 128, %s38_s13, [#allocation7]  }
   0x6   :  { %s61_s18 = sshll.u32 %s403_s17, 4  ;;  %s24_s21 = sshll.u32 %s490_s0, 4  ;;  %s62_s18 = int_to_ptr.vmem [resolvable:$true] %s61_s18  ;;  %s25_s21 = int_to_ptr.hbm [resolvable:$true] %s24_s21 }
   0x7   :  { %64 = dma.hbm_to_vmem [thread:$0]  %s60_s16, 128, %s62_s18, [#allocation10]  }
   0x8   :  { %s45_s23 = sshll.u32 %s492_s2, 4  ;;  %s404_s24 = smov [#allocation3]   ;;  %s46_s23 = int_to_ptr.hbm [resolvable:$true] %s45_s23 }
   0x9   :  { %s26_s25 = sshll.u32 %s404_s24, 4  ;;  %s405_s3 = smov [#allocation8]   ;;  %s27_s25 = int_to_ptr.vmem [resolvable:$true] %s26_s25 }
   0xa   :  { %29 = dma.hbm_to_vmem [thread:$0]  %s25_s21, 128, %s27_s25, [#allocation4]  }
   0xb   :  { %s47_s26 = sshll.u32 %s405_s3, 4  ;;  %s406_s27 = smov 128   ;;  %s48_s26 = int_to_ptr.vmem [resolvable:$true] %s47_s26 }
   0xc   :  { %s407_s28 = smov 8   ;;  %s71_s30 = sshll.u32 %s495_s5, 4  ;;  %s72_s30 = int_to_ptr.hbm [resolvable:$true] %s71_s30 }
   0xd   :  { %53 = dma.hbm_to_vmem [thread:$0]  %s46_s23, 384, %s48_s26, [#allocation7], %s406_s27, %s406_s27, %s407_s28  }
   0xe   :  { %s408_s10 = smov [#allocation11]  }
   0xf   :  { %s73_s11 = sshll.u32 %s408_s10, 4  ;;  %s74_s11 = int_to_ptr.vmem [resolvable:$true] %s73_s11 }
  0x10   :  { %79 = dma.hbm_to_vmem [thread:$0]  %s72_s30, 512, %s74_s11, [#allocation10], %s406_s27, %s406_s27, %s407_s28  }
  0x11   :  { %394 = dma.done.wait [#allocation4], 128  }
  0x12   :  { %395 = vsyncadd [#allocation4], 4294967168 }
  0x13   :  { %396 = dma.done.wait [#allocation7], 512  }
  0x14   :  { %397 = vsyncadd [#allocation7], 4294966784 }
  0x15   :  { %398 = dma.done.wait [#allocation10], 640  }
  0x16   :  { %399 = vsyncadd [#allocation10], 4294966656  ;;  %vm112_vm0 = vcmask 64512   ;;  %v109_v0 = vld [vmem:[#allocation8 + $0x10] sm:$0xff]  ;;  %v108_v1 = vld [vmem:[#allocation8 + $0x8] sm:$0xff]  ;;  %vm136_vm1 = vcmask 195584   ;;  %v211_v23 = vlaneseq  ;;  %v208_v24 = vstv %s498_s8 }
  0x17   :  { %v111_v2 = vld [vmem:[#allocation9] sm:$0xff]  ;;  %153 = vmatpush.msra.mxu1 %v109_v0  ;;  %v107_v3 = vld [vmem:[#allocation8] sm:$0xff]  ;;  %v106_v5 = vld [vmem:[#allocation3] sm:$0xff]  ;;  %vm174_vm2 = vcmask 261120   ;;  %s409_s17 = smov [#allocation12]   ;;  %s224_s20 = sshll.u32 %s499_s9, 4  ;;  %s225_s20 = int_to_ptr.hbm [resolvable:$true] %s224_s20 }
  0x18   :  { %131 = vmatpush.msra.mxu0 %v111_v2  ;;  %v110_v4 = vld [vmem:[#allocation6] sm:$0xff]  ;;  %v168_v7 = vld [vmem:[#allocation11 + $0x10] sm:$0xff]  ;;  %v167_v8 = vld [vmem:[#allocation11 + $0x8] sm:$0xff]  ;;  %v212_v25 = vand.u32 127, %v211_v23  ;;  %s222_s18 = sshll.u32 %s409_s17, 4  ;;  %vm215_vm3 = vcmask 57344   ;;  %s223_s18 = int_to_ptr.vmem [resolvable:$true] %s222_s18 }
  0x19   :  { %236 = vmatmul.msk.f32.vlgmr.msra.gmra.mxu0 %vm112_vm0, %v110_v4  ;;  %154 = vmatpush.msra.mxu1 %v108_v1  ;;  %v169_v6 = vld [vmem:[#allocation11 + $0x18] sm:$0xff]  ;;  %v166_v9 = vld [vmem:[#allocation11] sm:$0xff]  ;;  %v247_v11 = vld [vmem:[%s494_s4] ss:$0 sm:$0xff] }
  0x1a   :  { %190 = vmatpush.msra.mxu2 %v169_v6  ;;  %v248_v16 = vld [vmem:[%s496_s6] ss:$0 sm:$0xff] }
  0x1b   :  { %155 = vmatpush.msra.mxu1 %v107_v3  ;;  %v249_v19 = vld [vmem:[%s497_s7] ss:$0 sm:$0xff] }
  0x1c   :  { %237 = vmatmul.msk.f32.vlgmr.msra.gmra.mxu1 %vm136_vm1, %v106_v5  ;;  %191 = vmatpush.msra.mxu2 %v168_v7 }
  0x1e   :  { %192 = vmatpush.msra.mxu2 %v167_v8 }
  0x20   :  { %193 = vmatpush.msra.mxu2 %v166_v9 }
  0x96   :  { %v133_v10 = vpop.f32.mrf.mxu0 }
  0x99   :  { %v157_v12 = vpop.f32.mrf.mxu1 }
  0x9a   :  { %v158_v13 = vadd.f32 %v157_v12, %v133_v10 }
  0x9c   :  { %v164_v14 = vadd.f32 %v247_v11, %v158_v13 }
  0x9e   :  { %v165_v15 = vmax.f32 %v164_v14, 0.0 }
  0xa0   :  { %238 = vmatmul.msk.f32.vlgmr.msra.gmra.mxu2 %vm174_vm2, %v165_v15 }
 0x123   :  { %v195_v17 = vpop.f32.mrf.mxu2 }
 0x124   :  { %v196_v18 = vadd.f32 %v248_v16, %v195_v17 }
 0x126   :  { %v198_v20 = vmax.f32 %v196_v18, 0.0 }
 0x128   :  { %v203_v21 = vmul.f32 %v249_v19, %v198_v20 }
 0x12a   :  { %v204_v22 = vsel %vm174_vm2, %v203_v21, 0.0 }
 0x12b   :  { %205 = vadd.xlane.f32.xlu0 %v204_v22 }
 0x19e   :  { %v206_v26 = vpop.xlane.xlu0 %205 }
 0x19f   :  { %v209_v27 = vadd.f32 %v208_v24, %v206_v26 }
 0x1a1   :  { %v213_v28 = vperm.slane %v209_v27, %v212_v25 }
 0x1a3   :  { %216 = vst.msk [vmem:[#allocation12] sm:$0x1] %vm215_vm3, %v213_v28 }
 0x1a4   :  { %227 = dma.vmem_to_hbm [thread:$0]  %s223_s18, 16, %s225_s20, [#allocation5]  }
 0x1a5   :  { %400 = dma.done.wait [#allocation5], 16  }
 0x1a6   :  { %401 = vsyncadd [#allocation5], 4294967280 }
 0x1a7   :  { %232 = vsyncpa [#allocation4], 1 }
 0x1a8   :  { %233 = vsyncpa [#allocation7], 1 }
 0x1a9   :  { %234 = vsyncpa [#allocation10], 1 }
 0x1aa   :  { %235 = vsyncpa [#allocation5], 1 }

</bundles_post_ra>
